<compile_context>
chip_gen: v7x
topology: tpu7x:2x2x1
jax: 0.10.0
libtpu: 0.0.40
codegen_flags: <defaults>
</compile_context>

<pallas_src>
import jax
import jax.numpy as jnp
from jax.experimental import pallas as pl
from jax.experimental.pallas import tpu as pltpu


# ----------------------------- Fused Pallas kernel ----------------------------


def _fused_kernel(obs_ref, amean_ref, ids_ref,
                  wr_ref, br_ref,
                  wa1s_ref, wa1i_ref, ba1_ref, wa2_ref, ba2_ref,
                  wc1s_ref, wc1a_ref, wc1i_ref, bc1_ref, wc2_row_ref, bc2_ref,
                  out_ref):
    """Fused representation + actor + critic for one batch tile."""
    repr_dim = wr_ref.shape[1]
    act_dim = amean_ref.shape[1]

    # bf16 MXU inputs (cast once, reused), f32 accumulate, f32 elementwise.
    obs_b = obs_ref[...].astype(jnp.bfloat16)
    ids_b = ids_ref[...].astype(jnp.bfloat16)
    amean_b = amean_ref[...].astype(jnp.bfloat16)

    # Representation MLP (shared by both heads).
    state = jnp.maximum(
        jnp.dot(obs_b, wr_ref[...], preferred_element_type=jnp.float32)
        + br_ref[...], 0.0)
    state_b = state.astype(jnp.bfloat16)

    # ---- Actor head: [state | ids] @ Wa1 as two segment dots (no concat).
    h_a = jnp.maximum(
        jnp.dot(state_b, wa1s_ref[...], preferred_element_type=jnp.float32)
        + jnp.dot(ids_b, wa1i_ref[...], preferred_element_type=jnp.float32)
        + ba1_ref[...], 0.0)
    logits = (jnp.dot(h_a.astype(jnp.bfloat16), wa2_ref[...],
                      preferred_element_type=jnp.float32) + ba2_ref[...])

    # ---- Critic head: [state | actions_mean | ids] @ Wc1 as three segment dots.
    h_c = jnp.maximum(
        jnp.dot(state_b, wc1s_ref[...], preferred_element_type=jnp.float32)
        + jnp.dot(amean_b, wc1a_ref[...], preferred_element_type=jnp.float32)
        + jnp.dot(ids_b, wc1i_ref[...], preferred_element_type=jnp.float32)
        + bc1_ref[...], 0.0)
    # N=1 output head on the VPU/XLU (multiply + lane reduce) — no MXU pass.
    value = jnp.sum(h_c * wc2_row_ref[...], axis=-1, keepdims=True) + bc2_ref[...]

    # Pack everything into one lane-dense (TB, 128) output slab.
    out_ref[...] = jnp.zeros_like(out_ref)
    out_ref[:, :repr_dim] = state
    out_ref[:, repr_dim:repr_dim + act_dim] = logits
    out_ref[:, repr_dim + act_dim:repr_dim + act_dim + 1] = value


# ----------------------------- Wrapper -----------------------------------------


@jax.jit
def forward_and_critic(obs, actions_mean, agent_ids, params):
    """Fused equivalent of MeanFieldActorCriticPolicy.forward() + .critic().

    Returns (state, logits, value) with shapes (B, repr), (B, act_dim), (B, 1).
    """
    B, obs_dim = obs.shape
    act_dim = actions_mean.shape[1]
    n_agents = agent_ids.shape[1]
    repr_dim = params["wr"].shape[1]

    out_w = repr_dim + act_dim + 1
    out_pad = ((out_w + 127) // 128) * 128   # lane-dense output width

    # Batch tile: full batch if small, otherwise 256-row tiles (multiple of 8).
    tb = B if B <= 256 else 256
    grid = (pl.cdiv(B, tb),)

    def row_spec(f):                       # batch-tiled activation
        return pl.BlockSpec((tb, f), lambda i: (i, 0))

    def const_spec(arr):                   # VMEM-resident weight / bias
        return pl.BlockSpec(arr.shape, lambda i: (0, 0))

    in_specs = [
        row_spec(obs_dim), row_spec(act_dim), row_spec(n_agents),
        const_spec(params["wr"]), const_spec(params["br"]),
        const_spec(params["wa1_s"]), const_spec(params["wa1_i"]),
        const_spec(params["ba1"]),
        const_spec(params["wa2"]), const_spec(params["ba2"]),
        const_spec(params["wc1_s"]), const_spec(params["wc1_a"]),
        const_spec(params["wc1_i"]), const_spec(params["bc1"]),
        const_spec(params["wc2_row"]), const_spec(params["bc2"]),
    ]

    packed = pl.pallas_call(
        _fused_kernel,
        out_shape=jax.ShapeDtypeStruct((B, out_pad), jnp.float32),
        grid=grid,
        in_specs=in_specs,
        out_specs=pl.BlockSpec((tb, out_pad), lambda i: (i, 0)),
        compiler_params=pltpu.CompilerParams(dimension_semantics=("parallel",)),
    )(obs, actions_mean, agent_ids,
      params["wr"], params["br"],
      params["wa1_s"], params["wa1_i"], params["ba1"],
      params["wa2"], params["ba2"],
      params["wc1_s"], params["wc1_a"], params["wc1_i"], params["bc1"],
      params["wc2_row"], params["bc2"])

    state = packed[:, :repr_dim]
    logits = packed[:, repr_dim:repr_dim + act_dim]
    value = packed[:, repr_dim + act_dim:repr_dim + act_dim + 1]
    return state, logits, value


# ----------------------------- Parameter init ----------------------------------


def init_params(key, obs_dim, repr_dim, n_agents, action_dim,
                actor_hidden, critic_hidden):
    """Synthetic parameters; shapes follow the PyTorch module __init__.

    Matmul weights stored bf16 (native MXU on v6e/v7x, halves weight DMA);
    biases and the VPU-side critic output head stay f32. The first actor /
    critic layers are pre-split along their input (K) dim so the kernel can
    compute the concat-Linear as segment dots without building the concat.
    """
    def linear(k, fan_in, fan_out):
        lim = 1.0 / jnp.sqrt(fan_in)
        w = jax.random.uniform(k, (fan_in, fan_out), jnp.float32, -lim, lim)
        b = jnp.zeros((1, fan_out), jnp.float32)
        return w, b

    keys = jax.random.split(key, 5)
    wr, br = linear(keys[0], obs_dim, repr_dim)                                  # Basic_MLP
    wa1, ba1 = linear(keys[1], repr_dim + n_agents, actor_hidden)                # ActorNet l1
    wa2, ba2 = linear(keys[2], actor_hidden, action_dim)                         # ActorNet l2
    wc1, bc1 = linear(keys[3], repr_dim + action_dim + n_agents, critic_hidden)  # CriticNet l1
    wc2, bc2 = linear(keys[4], critic_hidden, 1)                                 # CriticNet l2

    bf = jnp.bfloat16
    return {
        "wr": wr.astype(bf), "br": br,
        # ActorNet layer 1, K-split: [state | agent_ids]
        "wa1_s": wa1[:repr_dim].astype(bf),
        "wa1_i": wa1[repr_dim:].astype(bf),
        "ba1": ba1,
        "wa2": wa2.astype(bf), "ba2": ba2,
        # CriticNet layer 1, K-split: [state | actions_mean | agent_ids]
        "wc1_s": wc1[:repr_dim].astype(bf),
        "wc1_a": wc1[repr_dim:repr_dim + action_dim].astype(bf),
        "wc1_i": wc1[repr_dim + action_dim:].astype(bf),
        "bc1": bc1,
        "wc2_row": wc2.T,   # (1, critic_hidden) f32 — consumed on the VPU
        "bc2": bc2,
    }


# ----------------------------- Pure-JAX reference -------------------------------


def ref_forward_and_critic(obs, amean, ids, p):
    """Reference with the concatenated-input formulation (torch semantics)."""
    def mxu(x, w):
        return jnp.dot(x.astype(jnp.bfloat16), w.astype(jnp.bfloat16),
                       preferred_element_type=jnp.float32)

    wa1 = jnp.concatenate([p["wa1_s"], p["wa1_i"]], axis=0)
    wc1 = jnp.concatenate([p["wc1_s"], p["wc1_a"], p["wc1_i"]], axis=0)

    state = jnp.maximum(mxu(obs, p["wr"]) + p["br"], 0.0)
    actor_in = jnp.concatenate([state, ids], axis=-1)
    h_a = jnp.maximum(mxu(actor_in, wa1) + p["ba1"], 0.0)
    logits = mxu(h_a, p["wa2"]) + p["ba2"]
    critic_in = jnp.concatenate([state, amean, ids], axis=-1)
    h_c = jnp.maximum(mxu(critic_in, wc1) + p["bc1"], 0.0)
    value = jnp.sum(h_c * p["wc2_row"], axis=-1, keepdims=True) + p["bc2"]
    return state, logits, value


# ----------------------------- Main ---------------------------------------------

if __name__ == "__main__":
    # Small shapes: batch (envs * agents flattened) = 8, obs_dim = 12,
    # n_agents = 4 (one-hot ids), action_dim = 5, repr = 32, hidden = 32.
    B, OBS_DIM, N_AGENTS, ACT_DIM = 8, 12, 4, 5
    REPR_DIM, A_HID, C_HID = 32, 32, 32

    key = jax.random.PRNGKey(0)
    k_obs, k_am, k_par = jax.random.split(key, 3)

    observation = jax.random.normal(k_obs, (B, OBS_DIM), jnp.float32)
    agent_ids = jax.nn.one_hot(jnp.arange(B) % N_AGENTS, N_AGENTS, dtype=jnp.float32)
    actions_mean = jax.nn.softmax(
        jax.random.normal(k_am, (B, ACT_DIM), jnp.float32), axis=-1)

    params = init_params(k_par, OBS_DIM, REPR_DIM, N_AGENTS, ACT_DIM, A_HID, C_HID)

    # Fused forward() + critic(): representation state, categorical logits, value.
    state, logits, value = forward_and_critic(observation, actions_mean,
                                              agent_ids, params)
    jax.block_until_ready((state, logits, value))

    # Verify against a pure-JAX reference using the same bf16-MXU / f32-accum math.
    ref_state, ref_logits, ref_value = ref_forward_and_critic(
        observation, actions_mean, agent_ids, params)
    assert jnp.allclose(state, ref_state, atol=1e-3, rtol=1e-3)
    assert jnp.allclose(logits, ref_logits, atol=1e-3, rtol=1e-3)
    assert jnp.allclose(value, ref_value, atol=1e-3, rtol=1e-3)
    assert state.shape == (B, REPR_DIM)
    assert logits.shape == (B, ACT_DIM) and value.shape == (B, 1)

    # TODO(synk): CategoricalDistribution sampling / log-prob / entropy is left to
    # the caller; the kernel returns the raw logits it would be parameterized with.
    print("KERNEL_OK")
</pallas_src>

<mosaic_0001>
module attributes {stable_mosaic.version = 11 : i64} {
  func.func @_fused_kernel(%arg0: i32, %arg1: memref<8x12xf32, #tpu.memory_space<vmem>>, %arg2: memref<8x5xf32, #tpu.memory_space<vmem>>, %arg3: memref<8x4xf32, #tpu.memory_space<vmem>>, %arg4: memref<12x32xbf16, #tpu.memory_space<vmem>>, %arg5: memref<1x32xf32, #tpu.memory_space<vmem>>, %arg6: memref<32x32xbf16, #tpu.memory_space<vmem>>, %arg7: memref<4x32xbf16, #tpu.memory_space<vmem>>, %arg8: memref<1x32xf32, #tpu.memory_space<vmem>>, %arg9: memref<32x5xbf16, #tpu.memory_space<vmem>>, %arg10: memref<1x5xf32, #tpu.memory_space<vmem>>, %arg11: memref<32x32xbf16, #tpu.memory_space<vmem>>, %arg12: memref<5x32xbf16, #tpu.memory_space<vmem>>, %arg13: memref<4x32xbf16, #tpu.memory_space<vmem>>, %arg14: memref<1x32xf32, #tpu.memory_space<vmem>>, %arg15: memref<1x32xf32, #tpu.memory_space<vmem>>, %arg16: memref<1x1xf32, #tpu.memory_space<vmem>>, %arg17: memref<8x128xf32, #tpu.memory_space<vmem>>) attributes {dimension_semantics = [#tpu.dimension_semantics<parallel>], iteration_bounds = array<i64: 1>, scalar_prefetch = 0 : i64, scratch_operands = 0 : i64, tpu.core_type = #tpu.core_type<tc>, window_params = [{transform_indices = @transform_0, window_bounds = array<i64: 8, 12>}, {transform_indices = @transform_1, window_bounds = array<i64: 8, 5>}, {transform_indices = @transform_2, window_bounds = array<i64: 8, 4>}, {pipeline_mode = #tpu.pipeline_mode<synchronous>, transform_indices = @transform_3, window_bounds = array<i64: 12, 32>}, {pipeline_mode = #tpu.pipeline_mode<synchronous>, transform_indices = @transform_4, window_bounds = array<i64: 1, 32>}, {pipeline_mode = #tpu.pipeline_mode<synchronous>, transform_indices = @transform_5, window_bounds = array<i64: 32, 32>}, {pipeline_mode = #tpu.pipeline_mode<synchronous>, transform_indices = @transform_6, window_bounds = array<i64: 4, 32>}, {pipeline_mode = #tpu.pipeline_mode<synchronous>, transform_indices = @transform_7, window_bounds = array<i64: 1, 32>}, {pipeline_mode = #tpu.pipeline_mode<synchronous>, transform_indices = @transform_8, window_bounds = array<i64: 32, 5>}, {pipeline_mode = #tpu.pipeline_mode<synchronous>, transform_indices = @transform_9, window_bounds = array<i64: 1, 5>}, {pipeline_mode = #tpu.pipeline_mode<synchronous>, transform_indices = @transform_10, window_bounds = array<i64: 32, 32>}, {pipeline_mode = #tpu.pipeline_mode<synchronous>, transform_indices = @transform_11, window_bounds = array<i64: 5, 32>}, {pipeline_mode = #tpu.pipeline_mode<synchronous>, transform_indices = @transform_12, window_bounds = array<i64: 4, 32>}, {pipeline_mode = #tpu.pipeline_mode<synchronous>, transform_indices = @transform_13, window_bounds = array<i64: 1, 32>}, {pipeline_mode = #tpu.pipeline_mode<synchronous>, transform_indices = @transform_14, window_bounds = array<i64: 1, 32>}, {pipeline_mode = #tpu.pipeline_mode<synchronous>, transform_indices = @transform_15, window_bounds = array<i64: 1, 1>}, {transform_indices = @transform_16, window_bounds = array<i64: 8, 128>}]} {
    %c0 = arith.constant 0 : index
    %c0_0 = arith.constant 0 : index
    %0 = vector.load %arg1[%c0, %c0_0] : memref<8x12xf32, #tpu.memory_space<vmem>>, vector<8x12xf32>
    %1 = arith.truncf %0 : vector<8x12xf32> to vector<8x12xbf16>
    %c0_1 = arith.constant 0 : index
    %c0_2 = arith.constant 0 : index
    %2 = vector.load %arg3[%c0_1, %c0_2] : memref<8x4xf32, #tpu.memory_space<vmem>>, vector<8x4xf32>
    %3 = arith.truncf %2 : vector<8x4xf32> to vector<8x4xbf16>
    %c0_3 = arith.constant 0 : index
    %c0_4 = arith.constant 0 : index
    %4 = vector.load %arg2[%c0_3, %c0_4] : memref<8x5xf32, #tpu.memory_space<vmem>>, vector<8x5xf32>
    %5 = arith.truncf %4 : vector<8x5xf32> to vector<8x5xbf16>
    %c0_5 = arith.constant 0 : index
    %c0_6 = arith.constant 0 : index
    %6 = vector.load %arg4[%c0_5, %c0_6] : memref<12x32xbf16, #tpu.memory_space<vmem>>, vector<12x32xbf16>
    %cst = arith.constant dense<0.000000e+00> : vector<8x32xf32>
    %7 = tpu.matmul %1, %6, %cst {dimension_numbers = #tpu.dot_dimension_numbers<[1], [0], [0], [1], [0, 0, 1, 1], [], []>} : vector<8x12xbf16>, vector<12x32xbf16>, vector<8x32xf32> -> vector<8x32xf32>
    %c0_7 = arith.constant 0 : index
    %c0_8 = arith.constant 0 : index
    %8 = vector.load %arg5[%c0_7, %c0_8] : memref<1x32xf32, #tpu.memory_space<vmem>>, vector<1x32xf32>
    %9 = vector.broadcast %8 : vector<1x32xf32> to vector<8x32xf32>
    %10 = arith.addf %7, %9 : vector<8x32xf32>
    %cst_9 = arith.constant 0.000000e+00 : f32
    %11 = vector.broadcast %cst_9 : f32 to vector<8x32xf32>
    %12 = arith.maximumf %10, %11 : vector<8x32xf32>
    %13 = arith.truncf %12 : vector<8x32xf32> to vector<8x32xbf16>
    %c0_10 = arith.constant 0 : index
    %c0_11 = arith.constant 0 : index
    %14 = vector.load %arg6[%c0_10, %c0_11] : memref<32x32xbf16, #tpu.memory_space<vmem>>, vector<32x32xbf16>
    %cst_12 = arith.constant dense<0.000000e+00> : vector<8x32xf32>
    %15 = tpu.matmul %13, %14, %cst_12 {dimension_numbers = #tpu.dot_dimension_numbers<[1], [0], [0], [1], [0, 0, 1, 1], [], []>} : vector<8x32xbf16>, vector<32x32xbf16>, vector<8x32xf32> -> vector<8x32xf32>
    %c0_13 = arith.constant 0 : index
    %c0_14 = arith.constant 0 : index
    %16 = vector.load %arg7[%c0_13, %c0_14] : memref<4x32xbf16, #tpu.memory_space<vmem>>, vector<4x32xbf16>
    %cst_15 = arith.constant dense<0.000000e+00> : vector<8x32xf32>
    %17 = tpu.matmul %3, %16, %cst_15 {dimension_numbers = #tpu.dot_dimension_numbers<[1], [0], [0], [1], [0, 0, 1, 1], [], []>} : vector<8x4xbf16>, vector<4x32xbf16>, vector<8x32xf32> -> vector<8x32xf32>
    %18 = arith.addf %15, %17 : vector<8x32xf32>
    %c0_16 = arith.constant 0 : index
    %c0_17 = arith.constant 0 : index
    %19 = vector.load %arg8[%c0_16, %c0_17] : memref<1x32xf32, #tpu.memory_space<vmem>>, vector<1x32xf32>
    %20 = vector.broadcast %19 : vector<1x32xf32> to vector<8x32xf32>
    %21 = arith.addf %18, %20 : vector<8x32xf32>
    %cst_18 = arith.constant 0.000000e+00 : f32
    %22 = vector.broadcast %cst_18 : f32 to vector<8x32xf32>
    %23 = arith.maximumf %21, %22 : vector<8x32xf32>
    %24 = arith.truncf %23 : vector<8x32xf32> to vector<8x32xbf16>
    %c0_19 = arith.constant 0 : index
    %c0_20 = arith.constant 0 : index
    %25 = vector.load %arg9[%c0_19, %c0_20] : memref<32x5xbf16, #tpu.memory_space<vmem>>, vector<32x5xbf16>
    %cst_21 = arith.constant dense<0.000000e+00> : vector<8x5xf32>
    %26 = tpu.matmul %24, %25, %cst_21 {dimension_numbers = #tpu.dot_dimension_numbers<[1], [0], [0], [1], [0, 0, 1, 1], [], []>} : vector<8x32xbf16>, vector<32x5xbf16>, vector<8x5xf32> -> vector<8x5xf32>
    %c0_22 = arith.constant 0 : index
    %c0_23 = arith.constant 0 : index
    %27 = vector.load %arg10[%c0_22, %c0_23] : memref<1x5xf32, #tpu.memory_space<vmem>>, vector<1x5xf32>
    %28 = vector.broadcast %27 : vector<1x5xf32> to vector<8x5xf32>
    %29 = arith.addf %26, %28 : vector<8x5xf32>
    %c0_24 = arith.constant 0 : index
    %c0_25 = arith.constant 0 : index
    %30 = vector.load %arg11[%c0_24, %c0_25] : memref<32x32xbf16, #tpu.memory_space<vmem>>, vector<32x32xbf16>
    %cst_26 = arith.constant dense<0.000000e+00> : vector<8x32xf32>
    %31 = tpu.matmul %13, %30, %cst_26 {dimension_numbers = #tpu.dot_dimension_numbers<[1], [0], [0], [1], [0, 0, 1, 1], [], []>} : vector<8x32xbf16>, vector<32x32xbf16>, vector<8x32xf32> -> vector<8x32xf32>
    %c0_27 = arith.constant 0 : index
    %c0_28 = arith.constant 0 : index
    %32 = vector.load %arg12[%c0_27, %c0_28] : memref<5x32xbf16, #tpu.memory_space<vmem>>, vector<5x32xbf16>
    %cst_29 = arith.constant dense<0.000000e+00> : vector<8x32xf32>
    %33 = tpu.matmul %5, %32, %cst_29 {dimension_numbers = #tpu.dot_dimension_numbers<[1], [0], [0], [1], [0, 0, 1, 1], [], []>} : vector<8x5xbf16>, vector<5x32xbf16>, vector<8x32xf32> -> vector<8x32xf32>
    %34 = arith.addf %31, %33 : vector<8x32xf32>
    %c0_30 = arith.constant 0 : index
    %c0_31 = arith.constant 0 : index
    %35 = vector.load %arg13[%c0_30, %c0_31] : memref<4x32xbf16, #tpu.memory_space<vmem>>, vector<4x32xbf16>
    %cst_32 = arith.constant dense<0.000000e+00> : vector<8x32xf32>
    %36 = tpu.matmul %3, %35, %cst_32 {dimension_numbers = #tpu.dot_dimension_numbers<[1], [0], [0], [1], [0, 0, 1, 1], [], []>} : vector<8x4xbf16>, vector<4x32xbf16>, vector<8x32xf32> -> vector<8x32xf32>
    %37 = arith.addf %34, %36 : vector<8x32xf32>
    %c0_33 = arith.constant 0 : index
    %c0_34 = arith.constant 0 : index
    %38 = vector.load %arg14[%c0_33, %c0_34] : memref<1x32xf32, #tpu.memory_space<vmem>>, vector<1x32xf32>
    %39 = vector.broadcast %38 : vector<1x32xf32> to vector<8x32xf32>
    %40 = arith.addf %37, %39 : vector<8x32xf32>
    %cst_35 = arith.constant 0.000000e+00 : f32
    %41 = vector.broadcast %cst_35 : f32 to vector<8x32xf32>
    %42 = arith.maximumf %40, %41 : vector<8x32xf32>
    %c0_36 = arith.constant 0 : index
    %c0_37 = arith.constant 0 : index
    %43 = vector.load %arg15[%c0_36, %c0_37] : memref<1x32xf32, #tpu.memory_space<vmem>>, vector<1x32xf32>
    %44 = vector.broadcast %43 : vector<1x32xf32> to vector<8x32xf32>
    %45 = arith.mulf %42, %44 : vector<8x32xf32>
    %cst_38 = arith.constant dense<0.000000e+00> : vector<8xf32>
    %46 = vector.multi_reduction <add>, %45, %cst_38 [1] : vector<8x32xf32> to vector<8xf32>
    %47 = vector.shape_cast %46 : vector<8xf32> to vector<8x1xf32>
    %c0_39 = arith.constant 0 : index
    %c0_40 = arith.constant 0 : index
    %48 = vector.load %arg16[%c0_39, %c0_40] : memref<1x1xf32, #tpu.memory_space<vmem>>, vector<1x1xf32>
    %49 = vector.broadcast %48 : vector<1x1xf32> to vector<8x1xf32>
    %50 = arith.addf %47, %49 : vector<8x1xf32>
    %cst_41 = arith.constant 0.000000e+00 : f32
    %51 = vector.broadcast %cst_41 : f32 to vector<8x128xf32>
    %c0_42 = arith.constant 0 : index
    %c0_43 = arith.constant 0 : index
    %52 = vector.load %arg17[%c0_42, %c0_43] : memref<8x128xf32, #tpu.memory_space<vmem>>, vector<8x128xf32>
    tpu.vector_store %arg17[%c0_42, %c0_43], %51 {strides = array<i32>} : memref<8x128xf32, #tpu.memory_space<vmem>>, vector<8x128xf32>,
    %c0_44 = arith.constant 0 : index
    %c0_45 = arith.constant 0 : index
    %53 = vector.load %arg17[%c0_44, %c0_45] : memref<8x128xf32, #tpu.memory_space<vmem>>, vector<8x32xf32>
    tpu.vector_store %arg17[%c0_44, %c0_45], %12 {strides = array<i32>} : memref<8x128xf32, #tpu.memory_space<vmem>>, vector<8x32xf32>,
    %c0_46 = arith.constant 0 : index
    %c32 = arith.constant 32 : index
    %54 = vector.load %arg17[%c0_46, %c32] : memref<8x128xf32, #tpu.memory_space<vmem>>, vector<8x5xf32>
    tpu.vector_store %arg17[%c0_46, %c32], %29 {strides = array<i32>} : memref<8x128xf32, #tpu.memory_space<vmem>>, vector<8x5xf32>,
    %c0_47 = arith.constant 0 : index
    %c37 = arith.constant 37 : index
    %55 = vector.load %arg17[%c0_47, %c37] : memref<8x128xf32, #tpu.memory_space<vmem>>, vector<8x1xf32>
    tpu.vector_store %arg17[%c0_47, %c37], %50 {strides = array<i32>} : memref<8x128xf32, #tpu.memory_space<vmem>>, vector<8x1xf32>,
    return
  }
  func.func @transform_0(%arg0: i32) -> (i32, i32) {
    %c0_i32 = arith.constant 0 : i32
    %c0_i32_0 = arith.constant 0 : i32
    return %arg0, %c0_i32 : i32, i32
  }
  func.func @transform_1(%arg0: i32) -> (i32, i32) {
    %c0_i32 = arith.constant 0 : i32
    %c0_i32_0 = arith.constant 0 : i32
    return %arg0, %c0_i32 : i32, i32
  }
  func.func @transform_2(%arg0: i32) -> (i32, i32) {
    %c0_i32 = arith.constant 0 : i32
    %c0_i32_0 = arith.constant 0 : i32
    return %arg0, %c0_i32 : i32, i32
  }
  func.func @transform_3(%arg0: i32) -> (i32, i32) {
    %c0_i32 = arith.constant 0 : i32
    %c0_i32_0 = arith.constant 0 : i32
    %c0_i32_1 = arith.constant 0 : i32
    return %c0_i32, %c0_i32_0 : i32, i32
  }
  func.func @transform_4(%arg0: i32) -> (i32, i32) {
    %c0_i32 = arith.constant 0 : i32
    %c0_i32_0 = arith.constant 0 : i32
    %c0_i32_1 = arith.constant 0 : i32
    return %c0_i32, %c0_i32_0 : i32, i32
  }
  func.func @transform_5(%arg0: i32) -> (i32, i32) {
    %c0_i32 = arith.constant 0 : i32
    %c0_i32_0 = arith.constant 0 : i32
    %c0_i32_1 = arith.constant 0 : i32
    return %c0_i32, %c0_i32_0 : i32, i32
  }
  func.func @transform_6(%arg0: i32) -> (i32, i32) {
    %c0_i32 = arith.constant 0 : i32
    %c0_i32_0 = arith.constant 0 : i32
    %c0_i32_1 = arith.constant 0 : i32
    return %c0_i32, %c0_i32_0 : i32, i32
  }
  func.func @transform_7(%arg0: i32) -> (i32, i32) {
    %c0_i32 = arith.constant 0 : i32
    %c0_i32_0 = arith.constant 0 : i32
    %c0_i32_1 = arith.constant 0 : i32
    return %c0_i32, %c0_i32_0 : i32, i32
  }
  func.func @transform_8(%arg0: i32) -> (i32, i32) {
    %c0_i32 = arith.constant 0 : i32
    %c0_i32_0 = arith.constant 0 : i32
    %c0_i32_1 = arith.constant 0 : i32
    return %c0_i32, %c0_i32_0 : i32, i32
  }
  func.func @transform_9(%arg0: i32) -> (i32, i32) {
    %c0_i32 = arith.constant 0 : i32
    %c0_i32_0 = arith.constant 0 : i32
    %c0_i32_1 = arith.constant 0 : i32
    return %c0_i32, %c0_i32_0 : i32, i32
  }
  func.func @transform_10(%arg0: i32) -> (i32, i32) {
    %c0_i32 = arith.constant 0 : i32
    %c0_i32_0 = arith.constant 0 : i32
    %c0_i32_1 = arith.constant 0 : i32
    return %c0_i32, %c0_i32_0 : i32, i32
  }
  func.func @transform_11(%arg0: i32) -> (i32, i32) {
    %c0_i32 = arith.constant 0 : i32
    %c0_i32_0 = arith.constant 0 : i32
    %c0_i32_1 = arith.constant 0 : i32
    return %c0_i32, %c0_i32_0 : i32, i32
  }
  func.func @transform_12(%arg0: i32) -> (i32, i32) {
    %c0_i32 = arith.constant 0 : i32
    %c0_i32_0 = arith.constant 0 : i32
    %c0_i32_1 = arith.constant 0 : i32
    return %c0_i32, %c0_i32_0 : i32, i32
  }
  func.func @transform_13(%arg0: i32) -> (i32, i32) {
    %c0_i32 = arith.constant 0 : i32
    %c0_i32_0 = arith.constant 0 : i32
    %c0_i32_1 = arith.constant 0 : i32
    return %c0_i32, %c0_i32_0 : i32, i32
  }
  func.func @transform_14(%arg0: i32) -> (i32, i32) {
    %c0_i32 = arith.constant 0 : i32
    %c0_i32_0 = arith.constant 0 : i32
    %c0_i32_1 = arith.constant 0 : i32
    return %c0_i32, %c0_i32_0 : i32, i32
  }
  func.func @transform_15(%arg0: i32) -> (i32, i32) {
    %c0_i32 = arith.constant 0 : i32
    %c0_i32_0 = arith.constant 0 : i32
    %c0_i32_1 = arith.constant 0 : i32
    return %c0_i32, %c0_i32_0 : i32, i32
  }
  func.func @transform_16(%arg0: i32) -> (i32, i32) {
    %c0_i32 = arith.constant 0 : i32
    %c0_i32_0 = arith.constant 0 : i32
    return %arg0, %c0_i32 : i32, i32
  }
}

</mosaic_0001>

<bundles_post_ra>
// kernel: forward_and_critic.1
= control target key start
LH: loop header
LB: loop body
LE: loop exit
PB: predicated region body
PF: predicated region fallthrough
CT: control target
= control target key end

     0   :  { %s988_s0 = inlined_call_operand.hbm [shape: f32[8,12], index: 0, kind: input, shape index: {}]   ;;  %s989_s1 = inlined_call_operand.hbm [shape: f32[8,5], index: 1, kind: input, shape index: {}]   ;;  %s990_s2 = inlined_call_operand.vmem [shape: f32[8,4], index: 2, kind: input, shape index: {}]   ;;  %s991_s3 = inlined_call_operand.vmem [shape: bf16[12,32], index: 3, kind: input, shape index: {}]   ;;  %s992_s4 = inlined_call_operand.vmem [shape: f32[1,32], index: 4, kind: input, shape index: {}]   ;;  %s993_s5 = inlined_call_operand.vmem [shape: bf16[32,32], index: 5, kind: input, shape index: {}]   ;;  %s994_s6 = inlined_call_operand.vmem [shape: bf16[4,32], index: 6, kind: input, shape index: {}]   ;;  %s995_s7 = inlined_call_operand.hbm [shape: f32[1,32], index: 7, kind: input, shape index: {}]   ;;  %s996_s8 = inlined_call_operand.vmem [shape: bf16[32,5], index: 8, kind: input, shape index: {}]   ;;  %s997_s9 = inlined_call_operand.hbm [shape: f32[1,5], index: 9, kind: input, shape index: {}]   ;;  %s998_s10 = inlined_call_operand.vmem [shape: bf16[32,32], index: 10, kind: input, shape index: {}]   ;;  %s999_s11 = inlined_call_operand.vmem [shape: bf16[5,32], index: 11, kind: input, shape index: {}]   ;;  %s1000_s12 = inlined_call_operand.vmem [shape: bf16[4,32], index: 12, kind: input, shape index: {}]   ;;  %s1001_s13 = inlined_call_operand.vmem [shape: f32[1,32], index: 13, kind: input, shape index: {}]   ;;  %s1002_s14 = inlined_call_operand.vmem [shape: f32[1,32], index: 14, kind: input, shape index: {}]   ;;  %s1003_s15 = inlined_call_operand.<no memory space> [shape: f32[1,1], index: 15, kind: input, shape index: {}]   ;;  %s1004_s16 = inlined_call_operand.vmem [shape: f32[8,128], index: 16, kind: output, shape index: {}]  }
   0x1   :  { %1006 = sst [smem:[#allocation13_spill]] %s988_s0  ;;  %v21_v0 = vstv %s1003_s15 }
   0x2   :  { %22 = vst [vmem:[#allocation2] sm:$0x1] %v21_v0 }
   0x3   :  { %23 = vsyncpa [#allocation4], 0 }
   0x4   :  { %24 = vsyncpa [#allocation6], 0 }
   0x5   :  { %25 = vsyncpa [#allocation9], 0  ;;  %s754_s23 = smov [#allocation5]   ;;  %s755_s25 = smov [#allocation3]  }
   0x6   :  { %s42_s24 = sshll.u32 %s754_s23, 4  ;;  %s32_s26 = sshll.u32 %s755_s25, 4  ;;  %s43_s24 = int_to_ptr.vmem [resolvable:$true] %s42_s24  ;;  %s33_s26 = int_to_ptr.vmem [resolvable:$true] %s32_s26 }
   0x7   :  { %s660_s29 = scalar_lea.hbm %s989_s1, 128 }
   0x8   :  { %p661_p0 = scmp.ne.s32.totalorder %s989_s1, %s660_s29  ;;  %p664_p1 = scmp.lt.u32.totalorder %s660_s29, %s989_s1 }
   0xa   :  { %p666_p2 = pnand %p664_p1, %p661_p0 }
   0xc   :  { %669 = shalt.err (!%p666_p2)
}
   0xd   :  { %s670_s18 = scalar_lea.vmem %s43_s24, 128  ;;  %p675_p4 = scmp.lt.s32.totalorder %s43_s24, %s43_s24 }
   0xe   :  { %p671_p3 = scmp.ne.s32.totalorder %s43_s24, %s670_s18  ;;  %p676_p5 = scmp.lt.s32.totalorder %s670_s18, %s670_s18 }
  0x10   :  { %p677_p6 = por %p676_p5, %p675_p4 }
  0x12   :  { %p678_p7 = pnand %p677_p6, %p671_p3 }
  0x14   :  { %681 = shalt.err (!%p678_p7)
}
  0x15   :  { %45 = dma.hbm_to_vmem [thread:$0]  %s989_s1, 128, %s43_s24, [#allocation6]  }
  0x16   :  { %s1007_s23 = sld [smem:[#allocation13_spill]] }
  0x1c   :  { %s682_s25 = scalar_lea.hbm %s1007_s23, 128 }
  0x1d   :  { %p683_p8 = scmp.ne.s32.totalorder %s1007_s23, %s682_s25  ;;  %p686_p9 = scmp.lt.u32.totalorder %s682_s25, %s1007_s23 }
  0x1f   :  { %p688_p10 = pnand %p686_p9, %p683_p8 }
  0x21   :  { %691 = shalt.err (!%p688_p10)
}
  0x22   :  { %s692_s0 = scalar_lea.vmem %s33_s26, 128  ;;  %p697_p12 = scmp.lt.s32.totalorder %s33_s26, %s33_s26 }
  0x23   :  { %p693_p11 = scmp.ne.s32.totalorder %s33_s26, %s692_s0  ;;  %p698_p13 = scmp.lt.s32.totalorder %s692_s0, %s692_s0 }
  0x25   :  { %p699_p0 = por %p698_p13, %p697_p12 }
  0x27   :  { %p700_p1 = pnand %p699_p0, %p693_p11 }
  0x29   :  { %703 = shalt.err (!%p700_p1)
}
  0x2a   :  { %35 = dma.hbm_to_vmem [thread:$0]  %s1007_s23, 128, %s33_s26, [#allocation4]  }
  0x2b   :  { %s756_s17 = smov [#allocation7]   ;;  %s757_s18 = smov [#allocation8]  }
  0x2c   :  { %s62_s15 = sshll.u32 %s756_s17, 4  ;;  %s74_s19 = sshll.u32 %s757_s18, 4  ;;  %s63_s15 = int_to_ptr.vmem [resolvable:$true] %s62_s15  ;;  %s75_s19 = int_to_ptr.vmem [resolvable:$true] %s74_s19 }
  0x2d   :  { %s704_s22 = scalar_lea.hbm %s995_s7, 16 }
  0x2e   :  { %p705_p2 = scmp.ne.s32.totalorder %s995_s7, %s704_s22  ;;  %p708_p3 = scmp.lt.u32.totalorder %s704_s22, %s995_s7 }
  0x30   :  { %p710_p4 = pnand %p708_p3, %p705_p2 }
  0x32   :  { %713 = shalt.err (!%p710_p4)
}
  0x33   :  { %s714_s26 = scalar_lea.vmem %s63_s15, 16  ;;  %s718_s23 = scalar_lea.vmem %s63_s15, 32 }
  0x34   :  { %p715_p5 = scmp.ne.s32.totalorder %s63_s15, %s714_s26  ;;  %p719_p6 = scmp.lt.s32.totalorder %s63_s15, %s63_s15 }
  0x35   :  { %p720_p7 = scmp.lt.s32.totalorder %s718_s23, %s714_s26 }
  0x37   :  { %p721_p8 = por %p720_p7, %p719_p6 }
  0x39   :  { %p722_p9 = pnand %p721_p8, %p715_p5 }
  0x3b   :  { %725 = shalt.err (!%p722_p9)
}
  0x3c   :  { %65 = dma.hbm_to_vmem [thread:$0]  %s995_s7, 16, %s63_s15, [#allocation6]  }
  0x3d   :  { %s726_s17 = scalar_lea.hbm %s997_s9, 16 }
  0x3e   :  { %p727_p10 = scmp.ne.s32.totalorder %s997_s9, %s726_s17  ;;  %p730_p11 = scmp.lt.u32.totalorder %s726_s17, %s997_s9 }
  0x40   :  { %p732_p12 = pnand %p730_p11, %p727_p10 }
  0x42   :  { %735 = shalt.err (!%p732_p12)
}
  0x43   :  { %s736_s25 = scalar_lea.vmem %s75_s19, 16  ;;  %s740_s27 = scalar_lea.vmem %s75_s19, 32 }
  0x44   :  { %p737_p13 = scmp.ne.s32.totalorder %s75_s19, %s736_s25  ;;  %p741_p0 = scmp.lt.s32.totalorder %s75_s19, %s75_s19 }
  0x45   :  { %p742_p1 = scmp.lt.s32.totalorder %s740_s27, %s736_s25 }
  0x47   :  { %p743_p2 = por %p742_p1, %p741_p0 }
  0x49   :  { %p744_p3 = pnand %p743_p2, %p737_p13 }
  0x4b   :  { %747 = shalt.err (!%p744_p3)
}
  0x4c   :  { %77 = dma.hbm_to_vmem [thread:$0]  %s997_s9, 16, %s75_s19, [#allocation9]  }
  0x4d   :  { %748 = dma.done.wait [#allocation4], 128  }
  0x4e   :  { %749 = vsyncadd [#allocation4], 4294967168 }
  0x4f   :  { %750 = dma.done.wait [#allocation6], 144  }
  0x50   :  { %751 = vsyncadd [#allocation6], 4294967152 }
  0x51   :  { %752 = dma.done.wait [#allocation9], 16  }
  0x52   :  { %753 = vsyncadd [#allocation9], 4294967280  ;;  %v758_v1 = vmov 0.0   ;;  %vm759_vm0 = vmmov 0   ;;  %vm127_vm1 = vcmask 1045504   ;;  %v103_v3 = vld [vmem:[#allocation3] sm:$0xff] }
  0x53   :  { %596 = vmatprep.subr.bf16.mxu0 %v758_v1  ;;  %538 = vst [vmem:[%s1004_s16] sm:$0xff] %v758_v1  ;;  %598 = vmatprep.mubr.msk.bf16.mxu0 %vm759_vm0, %v758_v1  ;;  %v653_v2 = vld [vmem:[%s991_s3] sm:$0x3f]   ;;  %v104_v5 = vpack.c.bf16 %v103_v3, %v103_v3  ;;  %vm123_vm2 = vcmask 97280   ;;  %vm182_vm3 = vcmask 1041408   ;;  %v655_v10 = vld [vmem:[%s993_s5 + $0x8] sm:$0xff]   ;;  %vm178_vm4 = vcmask 31744  }
  0x54   :  { %602 = vmatprep.subr.bf16.mxu1 %v758_v1  ;;  %604 = vmatprep.mubr.msk.bf16.mxu1 %vm759_vm0, %v758_v1  ;;  %v129_v4 = vsel %vm127_vm1, %v653_v2, 0  ;;  %v654_v6 = vld [vmem:[%s993_s5] sm:$0xff]   ;;  %vm367_vm5 = vcmask 1042432   ;;  %v760_v13 = vmov 65535   ;;  %vm238_vm6 = vcmask 261120   ;;  %v657_v30 = vld [vmem:[%s996_s8 + $0x8] sm:$0xff]  }
  0x55   :  { %597 = vmatpush3.bf16.msra.mxu0 %v129_v4  ;;  %v177_v7 = vld [vmem:[%s994_s6] sm:$0x3]  ;;  %v368_v14 = vsel %vm182_vm3, 4294967295, %v760_v13  ;;  %v107_v31 = vld [vmem:[#allocation5] sm:$0xff]  ;;  %vm363_vm7 = vcmask 39936   ;;  %s761_s26 = smov 32  }
  0x56   :  { %608 = vmatprep.subr.bf16.mxu0 %v758_v1  ;;  %v184_v8 = vsel %vm182_vm3, %v177_v7, 0  ;;  %v105_v9 = vld [vmem:[%s990_s2] sm:$0xff]  ;;  %v369_v19 = vsel %vm367_vm5, %v368_v14, 0  ;;  %v108_v32 = vpack.c.bf16 %v107_v31, %v107_v31  ;;  %v566_v36 = vld [vmem:[#allocation7] ss:$0 sm:$0xff]  ;;  %v659_v45 = vld [vmem:[%s998_s10 + $0x8] sm:$0xff]  }
  0x57   :  { %603 = vmatpush3.bf16.msra.mxu1 %v184_v8  ;;  %v106_v11 = vpack.c.bf16 %v105_v9, %v105_v9  ;;  %v559_v12 = vld [vmem:[%s992_s4] ss:$0 sm:$0xff]  ;;  %vm544_vm8 = vcmask 302336   ;;  %vm550_vm9 = vcmask 310568  }
  0x58   :  { %599 = vmatmul.mubr.msk.bf16.vlgmr.msra.gmra.mrb[0].mxu0 %vm123_vm2, %v104_v5  ;;  %616 = vmatprep.subr.bf16.mxu1 %v758_v1  ;;  %v362_v18 = vld [vmem:[%s999_s11] sm:$0x7] }
  0x59   :  { %609 = vmatpush3.bf16.msra.mxu0 %v654_v6  ;;  %612 = vmatprep.mubr.msk.bf16.mxu0 %vm759_vm0, %v758_v1  ;;  %v371_v23 = vand.u32 %v369_v19, %v362_v18  ;;  %v656_v29 = vld [vmem:[%s996_s8] sm:$0xff]   ;;  %v567_v6 = vld [vmem:[#allocation8] ss:$0 sm:$0xff] }
  0x5a   :  { %610 = vmatprep.subr.bf16.mxu0 %v758_v1  ;;  %605 = vmatmul.mubr.msk.bf16.vlgmr.msra.gmra.mrb[0].mxu1 %vm178_vm4, %v106_v11  ;;  %v465_v33 = vld [vmem:[%s1000_s12] sm:$0x3] }
  0x5b   :  { %620 = vmatprep.mubr.msk.bf16.mxu1 %vm759_vm0, %v758_v1  ;;  %617 = vmatpush3.bf16.msra.mxu1 %v656_v29  ;;  %v467_v34 = vsel %vm182_vm3, %v465_v33, 0  ;;  %v658_v43 = vld [vmem:[%s998_s10] sm:$0xff]  }
  0x5c   :  { %618 = vmatprep.subr.bf16.mxu1 %v758_v1  ;;  %v576_v62 = vld [vmem:[%s1001_s13] ss:$0 sm:$0xff]  ;;  %s762_s13 = smov 37  }
  0x5d   :  { %611 = vmatpush3.bf16.msra.mxu0 %v655_v10  ;;  %v577_v2 = vld [vmem:[%s1002_s14] ss:$0 sm:$0xff] }
  0x5e   :  { %624 = vmatprep.subr.bf16.mxu0 %v758_v1  ;;  %v578_v8 = vld [vmem:[#allocation2] ss:$0 sm:$0xff] }
  0x5f   :  { %619 = vmatpush3.bf16.msra.mxu1 %v657_v30 }
  0x60   :  { %630 = vmatprep.subr.bf16.mxu1 %v758_v1 }
 0x12b   :  { %v165_v15 = vpop.f32.mrb[0].mxu0 }
 0x12c   :  { %v166_v16 = vadd.f32 %v559_v12, %v165_v15  ;;  %v600_v17 = vpop.f32.mrb[1].mxu0 }
 0x12d   :  { %v168_v20 = vpop.f32.mrb[2].mxu0  ;;  %v220_v25 = vpop.f32.mrb[0].mxu1 }
 0x12e   :  { %v171_v21 = vmax.f32 %v166_v16, 0.0  ;;  %v601_v22 = vpop.f32.mrb[3].mxu0  ;;  %v606_v26 = vpop.f32.mrb[1].mxu1 }
 0x12f   :  { %v223_v27 = vpop.f32.mrb[2].mxu1 }
 0x130   :  { %v172_v24 = vpack.c.bf16 %v171_v21, %v171_v21  ;;  %539 = vst.msk [vmem:[%s1004_s16] sm:$0xff] %vm238_vm6, %v171_v21  ;;  %v607_v28 = vpop.f32.mrb[3].mxu1 }
 0x132   :  { %613 = vmatmul.mubr.msk.bf16.vlgmr.msra.gmra.mrb[4].mxu0 %vm238_vm6, %v172_v24 }
 0x133   :  { %625 = vmatpush3.bf16.msra.mxu0 %v371_v23  ;;  %626 = vmatprep.mubr.msk.bf16.mxu0 %vm759_vm0, %v758_v1 }
 0x134   :  { %638 = vmatprep.subr.bf16.mxu0 %v758_v1 }
 0x13a   :  { %627 = vmatmul.mubr.msk.bf16.vlgmr.msra.gmra.mrb[8].mxu0 %vm363_vm7, %v108_v32 }
 0x13b   :  { %640 = vmatprep.mubr.msk.bf16.mxu0 %vm759_vm0, %v758_v1  ;;  %639 = vmatpush3.bf16.msra.mxu0 %v467_v34 }
 0x142   :  { %641 = vmatmul.mubr.msk.bf16.vlgmr.msra.gmra.mrb[12].mxu0 %vm178_vm4, %v106_v11 }
 0x205   :  { %v276_v35 = vpop.f32.mrb[4].mxu0 }
 0x206   :  { %v277_v37 = vadd.f32 %v276_v35, %v220_v25  ;;  %v614_v38 = vpop.f32.mrb[5].mxu0 }
 0x207   :  { %v279_v39 = vpop.f32.mrb[6].mxu0 }
 0x208   :  { %v289_v40 = vadd.f32 %v566_v36, %v277_v37  ;;  %v615_v41 = vpop.f32.mrb[7].mxu0 }
 0x20a   :  { %v290_v42 = vmax.f32 %v289_v40, 0.0 }
 0x20c   :  { %v291_v44 = vpack.c.bf16 %v290_v42, %v290_v42 }
 0x20d   :  { %v407_v46 = vpop.f32.mrb[8].mxu0 }
 0x20e   :  { %621 = vmatmul.mubr.msk.bf16.vlgmr.msra.gmra.mrb[4].mxu1 %vm238_vm6, %v291_v44  ;;  %v628_v47 = vpop.f32.mrb[9].mxu0 }
 0x20f   :  { %631 = vmatpush3.bf16.msra.mxu1 %v658_v43  ;;  %634 = vmatprep.mubr.msk.bf16.mxu1 %vm759_vm0, %v758_v1  ;;  %v410_v48 = vpop.f32.mrb[10].mxu0 }
 0x210   :  { %632 = vmatprep.subr.bf16.mxu1 %v758_v1  ;;  %v629_v49 = vpop.f32.mrb[11].mxu0 }
 0x213   :  { %633 = vmatpush3.bf16.msra.mxu1 %v659_v45 }
 0x215   :  { %v503_v50 = vpop.f32.mrb[12].mxu0 }
 0x216   :  { %635 = vmatmul.mubr.msk.bf16.vlgmr.msra.gmra.mrb[8].mxu1 %vm238_vm6, %v172_v24  ;;  %v642_v51 = vpop.f32.mrb[13].mxu0 }
 0x217   :  { %v506_v52 = vpop.f32.mrb[14].mxu0 }
 0x218   :  { %v643_v53 = vpop.f32.mrb[15].mxu0 }
 0x2e1   :  { %v352_v54 = vpop.f32.mrb[4].mxu1 }
 0x2e2   :  { %v622_v55 = vpop.f32.mrb[5].mxu1  ;;  %v353_v7 = vadd.f32 %v567_v6, %v352_v54 }
 0x2e3   :  { %v355_v56 = vpop.f32.mrb[6].mxu1 }
 0x2e4   :  { %v623_v57 = vpop.f32.mrb[7].mxu1 }
 0x2e9   :  { %v459_v58 = vpop.f32.mrb[8].mxu1 }
 0x2ea   :  { %v460_v59 = vadd.f32 %v459_v58, %v407_v46  ;;  %v636_v60 = vpop.f32.mrb[9].mxu1 }
 0x2eb   :  { %v462_v61 = vpop.f32.mrb[10].mxu1 }
 0x2ec   :  { %v509_v63 = vadd.f32 %v503_v50, %v460_v59  ;;  %v637_v0 = vpop.f32.mrb[11].mxu1 }
 0x2ee   :  { %v517_v1 = vadd.f32 %v576_v62, %v509_v63 }
 0x2f0   :  { %v518_v3 = vmax.f32 %v517_v1, 0.0 }
 0x2f2   :  { %v526_v4 = vmul.f32 %v577_v2, %v518_v3 }
 0x2f4   :  { %v527_v5 = vsel %vm238_vm6, %v526_v4, 0.0 }
 0x2f5   :  { %528 = vadd.xlane.f32.xlu0 %v527_v5 }
 0x30b   :  { %541 = vrot.lane.b32.xlu0 %v353_v7, %s761_s26 }
 0x382   :  { %v529_v9 = vpop.xlane.xlu0 %528 }
 0x383   :  { %v537_v10 = vadd.f32 %v578_v8, %v529_v9 }
 0x385   :  { %547 = vrot.lane.b32.xlu1 %v537_v10, %s762_s13 }
 0x386   :  { %v542_v11 = vpop.permute.xlu0 %541 }
 0x387   :  { %545 = vst.msk [vmem:[%s1004_s16] sm:$0xff] %vm544_vm8, %v542_v11 }
 0x3f7   :  { %v548_v12 = vpop.permute.xlu1 %547 }
 0x3f8   :  { %551 = vst.msk [vmem:[%s1004_s16] sm:$0xff] %vm550_vm9, %v548_v12 }
 0x3f9   :  { %556 = vsyncpa [#allocation4], 1 }
 0x3fa   :  { %557 = vsyncpa [#allocation6], 1 }
 0x3fb   :  { %558 = vsyncpa [#allocation9], 1 }

</bundles_post_ra>
